<compile_context>
chip_gen: v7x
topology: tpu7x:2x2x1
jax: 0.10.0
libtpu: 0.0.40
codegen_flags: <defaults>
</compile_context>

<pallas_src>
import functools

import jax
import jax.numpy as jnp
from jax.experimental import pallas as pl
from jax.experimental.pallas import tpu as pltpu


def _lstm_cell_kernel(xs_ref, xr_ref, xw_ref, hc_ref, w_ref, b_ref, hc_out_ref,
                      *, rnn_size):
    R = rnn_size
    cdtype = w_ref.dtype  # bf16 weights -> bf16 MXU operands, f32 accumulation

    h_prev = hc_ref[:, 0:R]                                   # packed [h | c]
    c_prev = hc_ref[:, R:2 * R].astype(jnp.float32)

    # Fused gate pre-activations: four dot-accumulates against statically
    # sliced blocks of the resident fused weight (7R, 4R).
    gates = jnp.dot(xs_ref[...].astype(cdtype), w_ref[0:2 * R, :],
                    preferred_element_type=jnp.float32)
    gates = gates + jnp.dot(xr_ref[...].astype(cdtype), w_ref[2 * R:5 * R, :],
                            preferred_element_type=jnp.float32)
    gates = gates + jnp.dot(xw_ref[...].astype(cdtype), w_ref[5 * R:6 * R, :],
                            preferred_element_type=jnp.float32)
    gates = gates + jnp.dot(h_prev.astype(cdtype), w_ref[6 * R:7 * R, :],
                            preferred_element_type=jnp.float32)
    gates = gates + b_ref[...]  # (1, 4R) f32 bias, broadcasts over batch

    # Single transcendental pass over the whole (bb, 4R) tile:
    #   tanh(x) = 2*sigmoid(2x) - 1
    # Pre-scale the tanh lanes by 2 (VPU), one sigmoid sweep (EUP), then fix
    # the tanh lanes up with cheap VPU ops.  Halves EUP pushes vs. running
    # both sigmoid and tanh full-width.
    lane = jax.lax.broadcasted_iota(jnp.int32, gates.shape, dimension=1)
    is_tanh_lane = lane >= 3 * R
    pre = jnp.where(is_tanh_lane, 2.0 * gates, gates)
    sig = jax.nn.sigmoid(pre)
    act = jnp.where(is_tanh_lane, 2.0 * sig - 1.0, sig)

    in_gate = act[:, 0:R]
    forget_gate = act[:, R:2 * R]
    out_gate = act[:, 2 * R:3 * R]
    new_info = act[:, 3 * R:4 * R]

    state_c = forget_gate * c_prev + in_gate * new_info
    state_h = out_gate * jnp.tanh(state_c)

    # Packed [h | c] output: one 2R-lane-wide tile instead of two R-wide ones.
    hc_out_ref[...] = jnp.concatenate([state_h, state_c], axis=1).astype(hc_out_ref.dtype)


def prepare_fused_params(params, rnn_size, param_dtype=jnp.float32):
    """One-time fusion of the four Linear layers (do NOT call per step).

    params: PyTorch-convention weights:
        'W_scene' (4R, 2R), 'b_scene' (4R,)
        'W_rel'   (4R, 3R), 'b_rel'   (4R,)
        'W_word'  (4R,  R), 'b_word'  (4R,)
        'W_hid'   (4R,  R), 'b_hid'   (4R,)
    Returns {'W_fused': (7R, 4R) param_dtype, 'b_fused': (1, 4R) float32}.
    """
    R = rnn_size
    W_fused = jnp.concatenate(
        [params["W_scene"].T, params["W_rel"].T, params["W_word"].T, params["W_hid"].T],
        axis=0,
    ).astype(param_dtype)                                        # (7R, 4R)
    b_fused = (params["b_scene"] + params["b_rel"]
               + params["b_word"] + params["b_hid"]).astype(jnp.float32).reshape(1, 4 * R)
    return {"W_fused": W_fused, "b_fused": b_fused}


def _round_up(x, m):
    return ((x + m - 1) // m) * m


def _pick_batch_block(batch, rnn_size):
    """Batch block: biggest VMEM-safe block, no divisibility requirement.

    For large batches the block is sized so the batch-parallel grid has at
    least 2 steps (v7x: work for both TensorCores).  The tail block (if any)
    is padded by Pallas; rows are independent so padding is harmless.
    """
    # per-row streamed bytes (inputs 6R + packed state 2R in + 2R out), f32,
    # double-buffered -> activation budget of ~8 MiB.
    per_row = 10 * rnn_size * 4 * 2
    budget = 8 * 1024 * 1024
    cap = max(8, min(2048, (budget // per_row) // 8 * 8))
    if batch <= 256:
        return min(_round_up(batch, 8), cap)
    half = _round_up(-(-batch // 2), 8)      # ceil(B/2) rounded up to sublanes
    return min(half, cap)


def three_inputs_lstmcell(scene_feats, relation_feats, word, state, fused_params,
                          rnn_size, batch_block=None):
    """Functional equivalent of Three_inputs_lstmcell.forward (word_mask=None, eval).

    state: tuple (h, c), each (1, B, R)  -- matches PyTorch state[...][0] indexing.
    fused_params: output of prepare_fused_params().
    returns: (output, (state_h[None], state_c[None]))
    """
    last_h, last_c = state
    last_h, last_c = last_h[0], last_c[0]                  # (B, R) each

    B = scene_feats.shape[0]
    R = rnn_size
    W = fused_params["W_fused"]                            # (7R, 4R)
    b = fused_params["b_fused"]                            # (1, 4R)

    # Packed recurrent state [h | c]: wider, lane-denser state DMAs.  Kept f32
    # (or the caller's state dtype) so the recurrent c path stays full precision
    # even when streamed activations / weights are bf16.
    state_dtype = jnp.promote_types(last_h.dtype, last_c.dtype)
    hc = jnp.concatenate([last_h.astype(state_dtype), last_c.astype(state_dtype)], axis=1)

    bb = batch_block if batch_block is not None else _pick_batch_block(B, R)
    grid = (pl.cdiv(B, bb),)

    kernel = functools.partial(_lstm_cell_kernel, rnn_size=R)

    in_item = jnp.dtype(scene_feats.dtype).itemsize
    st_item = jnp.dtype(state_dtype).itemsize
    w_item = jnp.dtype(W.dtype).itemsize

    # Advisory cost estimate so XLA schedules surrounding ops around the call.
    cost = pl.CostEstimate(
        flops=2 * B * (7 * R) * (4 * R),
        transcendentals=B * 5 * R,                          # sigmoid(4R) + tanh(R)
        bytes_accessed=(B * 6 * R * in_item                 # streamed inputs
                        + 2 * B * 2 * R * st_item           # packed state in + out
                        + 28 * R * R * w_item + 4 * R * 4), # fused weight + bias
    )

    # Only raise the scoped-VMEM limit when the footprint actually needs it
    # (double-buffered streamed tiles + resident weight), else leave defaults.
    vmem_needed = (2 * bb * (6 * R * in_item + 4 * R * st_item)
                   + 2 * (28 * R * R * w_item + 4 * R * 4)
                   + (2 << 20))
    vmem_limit = int(vmem_needed * 1.25) if vmem_needed > (28 << 20) else None

    hc_out = pl.pallas_call(
        kernel,
        out_shape=jax.ShapeDtypeStruct((B, 2 * R), state_dtype),
        grid=grid,
        in_specs=[
            pl.BlockSpec((bb, 2 * R), lambda i: (i, 0)),     # scene    (B, 2R)
            pl.BlockSpec((bb, 3 * R), lambda i: (i, 0)),     # relation (B, 3R)
            pl.BlockSpec((bb, R), lambda i: (i, 0)),         # word     (B, R)
            pl.BlockSpec((bb, 2 * R), lambda i: (i, 0)),     # packed [h | c]
            pl.BlockSpec((7 * R, 4 * R), lambda i: (0, 0)),  # fused W, resident
            pl.BlockSpec((1, 4 * R), lambda i: (0, 0)),      # fused bias
        ],
        out_specs=pl.BlockSpec((bb, 2 * R), lambda i: (i, 0)),
        compiler_params=pltpu.CompilerParams(
            dimension_semantics=("parallel",),               # 2nd TC on v7x for big B
            vmem_limit_bytes=vmem_limit,
        ),
        cost_estimate=cost,
    )(scene_feats, relation_feats, word, hc, W, b)

    state_h = hc_out[:, 0:R]
    state_c = hc_out[:, R:2 * R]
    output = state_h  # dropout is identity in eval mode
    return output, (state_h[None], state_c[None])


def _reference(scene_feats, relation_feats, word, state, params, R):
    """Plain-JAX reference for correctness checking (unfused params)."""
    last_h, last_c = state[0][0], state[1][0]
    s = (scene_feats.astype(jnp.float32) @ params["W_scene"].T + params["b_scene"]
         + relation_feats.astype(jnp.float32) @ params["W_rel"].T + params["b_rel"]
         + word.astype(jnp.float32) @ params["W_word"].T + params["b_word"]
         + last_h @ params["W_hid"].T + params["b_hid"])
    sig = jax.nn.sigmoid(s[:, :3 * R])
    g = jnp.tanh(s[:, 3 * R:4 * R])
    i, f, o = sig[:, :R], sig[:, R:2 * R], sig[:, 2 * R:3 * R]
    c = f * last_c + i * g
    h = o * jnp.tanh(c)
    return h, c


if __name__ == "__main__":
    R = 32                 # rnn_size
    scene_size = 2 * R     # 64
    relation_size = 3 * R  # 96
    word_size = R          # 32

    key = jax.random.PRNGKey(0)
    ks = jax.random.split(key, 12)

    def make_inputs(B):
        scene = jax.random.normal(ks[0], (B, scene_size), dtype=jnp.float32)
        rel = jax.random.normal(ks[1], (B, relation_size), dtype=jnp.float32)
        wrd = jax.random.normal(ks[2], (B, word_size), dtype=jnp.float32)
        h0 = jax.random.normal(ks[3], (1, B, R), dtype=jnp.float32)
        c0 = jax.random.normal(ks[4], (1, B, R), dtype=jnp.float32)
        return scene, rel, wrd, h0, c0

    scale = 0.1
    params = {
        "W_scene": scale * jax.random.normal(ks[5], (4 * R, scene_size), dtype=jnp.float32),
        "b_scene": scale * jax.random.normal(ks[6], (4 * R,), dtype=jnp.float32),
        "W_rel":   scale * jax.random.normal(ks[7], (4 * R, relation_size), dtype=jnp.float32),
        "b_rel":   scale * jax.random.normal(ks[8], (4 * R,), dtype=jnp.float32),
        "W_word":  scale * jax.random.normal(ks[9], (4 * R, word_size), dtype=jnp.float32),
        "b_word":  scale * jax.random.normal(ks[10], (4 * R,), dtype=jnp.float32),
        "W_hid":   scale * jax.random.normal(ks[11], (4 * R, R), dtype=jnp.float32),
        "b_hid":   jnp.zeros((4 * R,), dtype=jnp.float32),
    }

    # One-time fusion (NOT per step).
    fused_f32 = prepare_fused_params(params, R, param_dtype=jnp.float32)
    fused_bf16 = prepare_fused_params(params, R, param_dtype=jnp.bfloat16)

    step = jax.jit(three_inputs_lstmcell, static_argnames=("rnn_size", "batch_block"))

    # ---- f32 path, B=8, single block (exactness check) --------------------
    B = 8
    scene, rel, wrd, h0, c0 = make_inputs(B)
    ref_h, ref_c = _reference(scene, rel, wrd, (h0, c0), params, R)
    output, (new_h, new_c) = step(scene, rel, wrd, (h0, c0), fused_f32, rnn_size=R)
    jax.block_until_ready((output, new_h, new_c))
    assert output.shape == (B, R) and new_h.shape == (1, B, R) and new_c.shape == (1, B, R)
    assert jnp.allclose(output, ref_h, atol=1e-5, rtol=1e-5)
    assert jnp.allclose(new_c[0], ref_c, atol=1e-5, rtol=1e-5)

    # ---- f32 path, B=20 with forced bb=8 -> 3 grid steps, padded tail -----
    B = 20
    scene, rel, wrd, h0, c0 = make_inputs(B)
    ref_h, ref_c = _reference(scene, rel, wrd, (h0, c0), params, R)
    out2, (h2, c2) = step(scene, rel, wrd, (h0, c0), fused_f32, rnn_size=R, batch_block=8)
    jax.block_until_ready(out2)
    assert jnp.allclose(out2, ref_h, atol=1e-5, rtol=1e-5)
    assert jnp.allclose(c2[0], ref_c, atol=1e-5, rtol=1e-5)

    # ---- bf16 weights + bf16 streamed activations (state stays f32) -------
    scene_bf = scene.astype(jnp.bfloat16)
    rel_bf = rel.astype(jnp.bfloat16)
    wrd_bf = wrd.astype(jnp.bfloat16)
    out_bf, (h_bf, c_bf) = step(scene_bf, rel_bf, wrd_bf, (h0, c0), fused_bf16, rnn_size=R)
    jax.block_until_ready(out_bf)
    assert jnp.allclose(out_bf.astype(jnp.float32), ref_h, atol=5e-2, rtol=5e-2)
    assert jnp.allclose(c_bf[0].astype(jnp.float32), ref_c, atol=5e-2, rtol=5e-2)

    print("KERNEL_OK")
</pallas_src>

<mosaic_0001>
module attributes {stable_mosaic.version = 11 : i64} {
  func.func @_lstm_cell_kernel(%arg0: i32, %arg1: memref<8x64xf32, #tpu.memory_space<vmem>>, %arg2: memref<8x96xf32, #tpu.memory_space<vmem>>, %arg3: memref<8x32xf32, #tpu.memory_space<vmem>>, %arg4: memref<8x64xf32, #tpu.memory_space<vmem>>, %arg5: memref<224x128xf32, #tpu.memory_space<vmem>>, %arg6: memref<1x128xf32, #tpu.memory_space<vmem>>, %arg7: memref<8x64xf32, #tpu.memory_space<vmem>>) attributes {dimension_semantics = [#tpu.dimension_semantics<parallel>], iteration_bounds = array<i64: 1>, scalar_prefetch = 0 : i64, scratch_operands = 0 : i64, tpu.core_type = #tpu.core_type<tc>, window_params = [{transform_indices = @transform_0, window_bounds = array<i64: 8, 64>}, {transform_indices = @transform_1, window_bounds = array<i64: 8, 96>}, {transform_indices = @transform_2, window_bounds = array<i64: 8, 32>}, {transform_indices = @transform_3, window_bounds = array<i64: 8, 64>}, {pipeline_mode = #tpu.pipeline_mode<synchronous>, transform_indices = @transform_4, window_bounds = array<i64: 224, 128>}, {pipeline_mode = #tpu.pipeline_mode<synchronous>, transform_indices = @transform_5, window_bounds = array<i64: 1, 128>}, {transform_indices = @transform_6, window_bounds = array<i64: 8, 64>}]} {
    %c0 = arith.constant 0 : index
    %c0_0 = arith.constant 0 : index
    %0 = vector.load %arg4[%c0, %c0_0] : memref<8x64xf32, #tpu.memory_space<vmem>>, vector<8x32xf32>
    %c0_1 = arith.constant 0 : index
    %c32 = arith.constant 32 : index
    %1 = vector.load %arg4[%c0_1, %c32] : memref<8x64xf32, #tpu.memory_space<vmem>>, vector<8x32xf32>
    %c0_2 = arith.constant 0 : index
    %c0_3 = arith.constant 0 : index
    %2 = vector.load %arg1[%c0_2, %c0_3] : memref<8x64xf32, #tpu.memory_space<vmem>>, vector<8x64xf32>
    %c0_4 = arith.constant 0 : index
    %c0_5 = arith.constant 0 : index
    %3 = vector.load %arg5[%c0_4, %c0_5] : memref<224x128xf32, #tpu.memory_space<vmem>>, vector<64x128xf32>
    %cst = arith.constant dense<0.000000e+00> : vector<8x128xf32>
    %4 = tpu.matmul %2, %3, %cst {dimension_numbers = #tpu.dot_dimension_numbers<[1], [0], [0], [1], [0, 0, 1, 1], [], []>} : vector<8x64xf32>, vector<64x128xf32>, vector<8x128xf32> -> vector<8x128xf32>
    %c0_6 = arith.constant 0 : index
    %c0_7 = arith.constant 0 : index
    %5 = vector.load %arg2[%c0_6, %c0_7] : memref<8x96xf32, #tpu.memory_space<vmem>>, vector<8x96xf32>
    %c64 = arith.constant 64 : index
    %c0_8 = arith.constant 0 : index
    %6 = vector.load %arg5[%c64, %c0_8] : memref<224x128xf32, #tpu.memory_space<vmem>>, vector<96x128xf32>
    %cst_9 = arith.constant dense<0.000000e+00> : vector<8x128xf32>
    %7 = tpu.matmul %5, %6, %cst_9 {dimension_numbers = #tpu.dot_dimension_numbers<[1], [0], [0], [1], [0, 0, 1, 1], [], []>} : vector<8x96xf32>, vector<96x128xf32>, vector<8x128xf32> -> vector<8x128xf32>
    %8 = arith.addf %4, %7 : vector<8x128xf32>
    %c0_10 = arith.constant 0 : index
    %c0_11 = arith.constant 0 : index
    %9 = vector.load %arg3[%c0_10, %c0_11] : memref<8x32xf32, #tpu.memory_space<vmem>>, vector<8x32xf32>
    %c160 = arith.constant 160 : index
    %c0_12 = arith.constant 0 : index
    %10 = vector.load %arg5[%c160, %c0_12] : memref<224x128xf32, #tpu.memory_space<vmem>>, vector<32x128xf32>
    %cst_13 = arith.constant dense<0.000000e+00> : vector<8x128xf32>
    %11 = tpu.matmul %9, %10, %cst_13 {dimension_numbers = #tpu.dot_dimension_numbers<[1], [0], [0], [1], [0, 0, 1, 1], [], []>} : vector<8x32xf32>, vector<32x128xf32>, vector<8x128xf32> -> vector<8x128xf32>
    %12 = arith.addf %8, %11 : vector<8x128xf32>
    %c192 = arith.constant 192 : index
    %c0_14 = arith.constant 0 : index
    %13 = vector.load %arg5[%c192, %c0_14] : memref<224x128xf32, #tpu.memory_space<vmem>>, vector<32x128xf32>
    %cst_15 = arith.constant dense<0.000000e+00> : vector<8x128xf32>
    %14 = tpu.matmul %0, %13, %cst_15 {dimension_numbers = #tpu.dot_dimension_numbers<[1], [0], [0], [1], [0, 0, 1, 1], [], []>} : vector<8x32xf32>, vector<32x128xf32>, vector<8x128xf32> -> vector<8x128xf32>
    %15 = arith.addf %12, %14 : vector<8x128xf32>
    %c0_16 = arith.constant 0 : index
    %c0_17 = arith.constant 0 : index
    %16 = vector.load %arg6[%c0_16, %c0_17] : memref<1x128xf32, #tpu.memory_space<vmem>>, vector<1x128xf32>
    %17 = vector.broadcast %16 : vector<1x128xf32> to vector<8x128xf32>
    %18 = arith.addf %15, %17 : vector<8x128xf32>
    %19 = tpu.iota {dimensions = array<i32: 1>} : vector<8x128xi32>
    %c96_i32 = arith.constant 96 : i32
    %20 = vector.broadcast %c96_i32 : i32 to vector<8x128xi32>
    %21 = arith.cmpi sge, %19, %20 : vector<8x128xi32>
    %cst_18 = arith.constant 2.000000e+00 : f32
    %22 = vector.broadcast %cst_18 : f32 to vector<8x128xf32>
    %23 = arith.mulf %22, %18 : vector<8x128xf32>
    %24 = arith.select %21, %23, %18 : vector<8x128xi1>, vector<8x128xf32>
    %25 = arith.negf %24 : vector<8x128xf32>
    %26 = math.exp %25 : vector<8x128xf32>
    %cst_19 = arith.constant 1.000000e+00 : f32
    %27 = vector.broadcast %cst_19 : f32 to vector<8x128xf32>
    %28 = arith.addf %27, %26 : vector<8x128xf32>
    %29 = arith.divf %27, %28 : vector<8x128xf32>
    %cst_20 = arith.constant 2.000000e+00 : f32
    %30 = vector.broadcast %cst_20 : f32 to vector<8x128xf32>
    %31 = arith.mulf %30, %29 : vector<8x128xf32>
    %cst_21 = arith.constant 1.000000e+00 : f32
    %32 = vector.broadcast %cst_21 : f32 to vector<8x128xf32>
    %33 = arith.subf %31, %32 : vector<8x128xf32>
    %34 = arith.select %21, %33, %29 : vector<8x128xi1>, vector<8x128xf32>
    %35 = vector.extract_strided_slice %34 {offsets = [0, 0], sizes = [8, 32], strides = [1, 1]} : vector<8x128xf32> to vector<8x32xf32>
    %36 = vector.extract_strided_slice %34 {offsets = [0, 32], sizes = [8, 32], strides = [1, 1]} : vector<8x128xf32> to vector<8x32xf32>
    %37 = vector.extract_strided_slice %34 {offsets = [0, 64], sizes = [8, 32], strides = [1, 1]} : vector<8x128xf32> to vector<8x32xf32>
    %38 = vector.extract_strided_slice %34 {offsets = [0, 96], sizes = [8, 32], strides = [1, 1]} : vector<8x128xf32> to vector<8x32xf32>
    %39 = arith.mulf %36, %1 : vector<8x32xf32>
    %40 = arith.mulf %35, %38 : vector<8x32xf32>
    %41 = arith.addf %39, %40 : vector<8x32xf32>
    %42 = math.tanh %41 : vector<8x32xf32>
    %43 = arith.mulf %37, %42 : vector<8x32xf32>
    %44 = tpu.concatenate %43, %41 in 1 : vector<8x32xf32>, vector<8x32xf32> -> vector<8x64xf32>
    %c0_22 = arith.constant 0 : index
    %c0_23 = arith.constant 0 : index
    %45 = vector.load %arg7[%c0_22, %c0_23] : memref<8x64xf32, #tpu.memory_space<vmem>>, vector<8x64xf32>
    tpu.vector_store %arg7[%c0_22, %c0_23], %44 {strides = array<i32>} : memref<8x64xf32, #tpu.memory_space<vmem>>, vector<8x64xf32>,
    return
  }
  func.func @transform_0(%arg0: i32) -> (i32, i32) {
    %c0_i32 = arith.constant 0 : i32
    %c0_i32_0 = arith.constant 0 : i32
    return %arg0, %c0_i32 : i32, i32
  }
  func.func @transform_1(%arg0: i32) -> (i32, i32) {
    %c0_i32 = arith.constant 0 : i32
    %c0_i32_0 = arith.constant 0 : i32
    return %arg0, %c0_i32 : i32, i32
  }
  func.func @transform_2(%arg0: i32) -> (i32, i32) {
    %c0_i32 = arith.constant 0 : i32
    %c0_i32_0 = arith.constant 0 : i32
    return %arg0, %c0_i32 : i32, i32
  }
  func.func @transform_3(%arg0: i32) -> (i32, i32) {
    %c0_i32 = arith.constant 0 : i32
    %c0_i32_0 = arith.constant 0 : i32
    return %arg0, %c0_i32 : i32, i32
  }
  func.func @transform_4(%arg0: i32) -> (i32, i32) {
    %c0_i32 = arith.constant 0 : i32
    %c0_i32_0 = arith.constant 0 : i32
    %c0_i32_1 = arith.constant 0 : i32
    return %c0_i32, %c0_i32_0 : i32, i32
  }
  func.func @transform_5(%arg0: i32) -> (i32, i32) {
    %c0_i32 = arith.constant 0 : i32
    %c0_i32_0 = arith.constant 0 : i32
    %c0_i32_1 = arith.constant 0 : i32
    return %c0_i32, %c0_i32_0 : i32, i32
  }
  func.func @transform_6(%arg0: i32) -> (i32, i32) {
    %c0_i32 = arith.constant 0 : i32
    %c0_i32_0 = arith.constant 0 : i32
    return %arg0, %c0_i32 : i32, i32
  }
}

</mosaic_0001>

<bundles_post_ra>
// kernel: three_inputs_lstmcell.1
= control target key start
LH: loop header
LB: loop body
LE: loop exit
PB: predicated region body
PF: predicated region fallthrough
CT: control target
= control target key end

     0   :  { %11 = vsyncpa [#allocation3], 0  ;;  %s603_s21 = smov [#allocation2]   ;;  %s703_s0 = inlined_call_operand.vmem [shape: f32[8,64], index: 0, kind: input, shape index: {}]   ;;  %s704_s1 = inlined_call_operand.vmem [shape: f32[8,96], index: 1, kind: input, shape index: {}]   ;;  %s705_s2 = inlined_call_operand.vmem [shape: f32[8,32], index: 2, kind: input, shape index: {}]   ;;  %s706_s3 = inlined_call_operand.vmem [shape: f32[8,64], index: 3, kind: input, shape index: {}]   ;;  %s707_s4 = inlined_call_operand.hbm [shape: f32[224,128], index: 4, kind: input, shape index: {}]   ;;  %s708_s5 = inlined_call_operand.vmem [shape: f32[1,128], index: 5, kind: input, shape index: {}]   ;;  %s709_s6 = inlined_call_operand.vmem [shape: f32[8,64], index: 6, kind: output, shape index: {}]  }
   0x1   :  { %s25_s22 = sshll.u32 %s603_s21, 4  ;;  %s579_s25 = scalar_lea.hbm %s707_s4, 3584  ;;  %s26_s22 = int_to_ptr.vmem [resolvable:$true] %s25_s22 }
   0x2   :  { %p580_p0 = scmp.ne.s32.totalorder %s707_s4, %s579_s25  ;;  %p583_p1 = scmp.lt.u32.totalorder %s579_s25, %s707_s4 }
   0x4   :  { %p585_p2 = pnand %p583_p1, %p580_p0 }
   0x6   :  { %588 = shalt.err (!%p585_p2)
}
   0x7   :  { %s589_s30 = scalar_lea.vmem %s26_s22, 3584  ;;  %p594_p4 = scmp.lt.s32.totalorder %s26_s22, %s26_s22 }
   0x8   :  { %p590_p3 = scmp.ne.s32.totalorder %s26_s22, %s589_s30  ;;  %p595_p5 = scmp.lt.s32.totalorder %s589_s30, %s589_s30 }
   0xa   :  { %p596_p6 = por %p595_p5, %p594_p4 }
   0xc   :  { %p597_p7 = pnand %p596_p6, %p590_p3 }
   0xe   :  { %600 = shalt.err (!%p597_p7)
}
   0xf   :  { %s604_s7 = smov 128   ;;  %s605_s8 = smov 8  }
  0x10   :  { %31 = dma.hbm_to_vmem [thread:$0]  %s707_s4, 3584, %s26_s22, [#allocation3], %s604_s7, %s604_s7, %s605_s8  }
  0x11   :  { %601 = dma.done.wait [#allocation3], 3584  }
  0x12   :  { %602 = vsyncadd [#allocation3], 4294963712  ;;  %v606_v0 = vmov 0.0|0.0   ;;  %vm607_vm0 = vmmov 0   ;;  %v608_v1 = vmov 0.0   ;;  %v48_v2 = vld [vmem:[#allocation2 + $0x40] sm:$0xff]  ;;  %v374_v56 = vlaneseq }
  0x13   :  { %523 = vmatprep.subr.bf16.mxu0 %v606_v0  ;;  %541 = vmatprep.subr.bf16.mxu1 %v606_v0  ;;  %v49_v3 = vld [vmem:[#allocation2 + $0x48] sm:$0xff]  ;;  %v39_v4 = vld [vmem:[#allocation2] sm:$0xff]  ;;  %v50_v7 = vld [vmem:[#allocation2 + $0x50] sm:$0xff]  ;;  %vm134_vm1 = vcmask 523264   ;;  %vm60_vm2 = vcmask 785408   ;;  %vm213_vm3 = vcmask 261120  }
  0x14   :  { %498 = vmatprep.mubr.msk.f32.mxu1 %vm607_vm0, %v608_v1  ;;  %479 = vmatprep.mubr.msk.f32.mxu0 %vm607_vm0, %v608_v1  ;;  %v524_v5 = vpack.c.bf16 %v49_v3, %v48_v2  ;;  %v40_v6 = vld [vmem:[#allocation2 + $0x8] sm:$0xff]  ;;  %v51_v8 = vld [vmem:[#allocation2 + $0x58] sm:$0xff]  ;;  %v41_v10 = vld [vmem:[#allocation2 + $0x10] sm:$0xff]  ;;  %v375_v59 = vand.u32 127, %v374_v56 }
  0x15   :  { %v542_v9 = vpack.c.bf16 %v40_v6, %v39_v4  ;;  %v42_v11 = vld [vmem:[#allocation2 + $0x18] sm:$0xff]  ;;  %v527_v12 = vpack.c.bf16 %v51_v8, %v50_v7  ;;  %v52_v14 = vld [vmem:[#allocation2 + $0x60] sm:$0xff]  ;;  %v53_v15 = vld [vmem:[#allocation2 + $0x68] sm:$0xff] }
  0x16   :  { %525 = vmatpush3.bf16.msra.mxu0 %v524_v5  ;;  %v545_v13 = vpack.c.bf16 %v42_v11, %v41_v10  ;;  %v43_v16 = vld [vmem:[#allocation2 + $0x20] sm:$0xff]  ;;  %v44_v17 = vld [vmem:[#allocation2 + $0x28] sm:$0xff]  ;;  %v530_v18 = vpack.c.bf16 %v53_v15, %v52_v14  ;;  %v54_v20 = vld [vmem:[#allocation2 + $0x70] sm:$0xff]  ;;  %vm376_vm4 = vcmp.ge.s32.totalorder %v375_v59, 96 }
  0x17   :  { %543 = vmatpush3.bf16.msra.mxu1 %v542_v9  ;;  %526 = vmatprep.subr.bf16.mxu0 %v606_v0  ;;  %v548_v19 = vpack.c.bf16 %v44_v17, %v43_v16  ;;  %v55_v21 = vld [vmem:[#allocation2 + $0x78] sm:$0xff]  ;;  %v45_v22 = vld [vmem:[#allocation2 + $0x30] sm:$0xff]  ;;  %v56_v26 = vld [vmem:[#allocation2 + $0x80] sm:$0xff] }
  0x18   :  { %544 = vmatprep.subr.bf16.mxu1 %v606_v0  ;;  %v46_v23 = vld [vmem:[#allocation2 + $0x38] sm:$0xff]  ;;  %v533_v24 = vpack.c.bf16 %v55_v21, %v54_v20  ;;  %v57_v27 = vld [vmem:[#allocation2 + $0x88] sm:$0xff]  ;;  %v209_v28 = vld [vmem:[#allocation2 + $0xa0] sm:$0xff] }
  0x19   :  { %v551_v25 = vpack.c.bf16 %v46_v23, %v45_v22  ;;  %v210_v29 = vld [vmem:[#allocation2 + $0xa8] sm:$0xff]  ;;  %v536_v30 = vpack.c.bf16 %v57_v27, %v56_v26  ;;  %v38_v31 = vld [vmem:[%s703_s0] sm:$0xff]  ;;  %v58_v33 = vld [vmem:[#allocation2 + $0x90] sm:$0xff] }
  0x1a   :  { %528 = vmatpush3.bf16.msra.mxu0 %v527_v12  ;;  %v554_v32 = vpack.c.bf16 %v210_v29, %v209_v28  ;;  %v59_v34 = vld [vmem:[#allocation2 + $0x98] sm:$0xff]  ;;  %v211_v35 = vld [vmem:[#allocation2 + $0xb0] sm:$0xff]  ;;  %v288_v39 = vld [vmem:[#allocation2 + $0xc0] sm:$0xff] }
  0x1b   :  { %546 = vmatpush3.bf16.msra.mxu1 %v545_v13  ;;  %529 = vmatprep.subr.bf16.mxu0 %v606_v0  ;;  %v212_v36 = vld [vmem:[#allocation2 + $0xb8] sm:$0xff]  ;;  %v539_v37 = vpack.c.bf16 %v59_v34, %v58_v33  ;;  %v289_v40 = vld [vmem:[#allocation2 + $0xc8] sm:$0xff]  ;;  %v47_v41 = vld [vmem:[%s704_s1] sm:$0xff] }
  0x1c   :  { %547 = vmatprep.subr.bf16.mxu1 %v606_v0  ;;  %v557_v38 = vpack.c.bf16 %v212_v36, %v211_v35  ;;  %v560_v42 = vpack.c.bf16 %v289_v40, %v288_v39  ;;  %v208_v43 = vld [vmem:[%s705_s2] sm:$0xff]  ;;  %v290_v44 = vld [vmem:[#allocation2 + $0xd0] sm:$0xff]  ;;  %v291_v45 = vld [vmem:[#allocation2 + $0xd8] sm:$0xff] }
  0x1d   :  { %v563_v46 = vpack.c.bf16 %v291_v45, %v290_v44  ;;  %v37_v47 = vld [vmem:[%s706_s3] sm:$0xff]  ;;  %s609_s3 = smov 32  }
  0x1e   :  { %531 = vmatpush3.bf16.msra.mxu0 %v530_v18  ;;  %v420_v58 = vld [vmem:[%s708_s5] ss:$0 sm:$0xff]  ;;  %s610_s5 = smov 64  }
  0x1f   :  { %549 = vmatpush3.bf16.msra.mxu1 %v548_v19  ;;  %532 = vmatprep.subr.bf16.mxu0 %v606_v0 }
  0x20   :  { %550 = vmatprep.subr.bf16.mxu1 %v606_v0 }
  0x22   :  { %534 = vmatpush3.bf16.msra.mxu0 %v533_v24 }
  0x23   :  { %552 = vmatpush3.bf16.msra.mxu1 %v551_v25  ;;  %535 = vmatprep.subr.bf16.mxu0 %v606_v0 }
  0x24   :  { %553 = vmatprep.subr.bf16.mxu1 %v606_v0 }
  0x26   :  { %537 = vmatpush3.bf16.msra.mxu0 %v536_v30  ;;  %499 = vmatmul.mubr.msk.f32.vlgmr.msra.gmra.mrb[0].mxu1 %vm134_vm1, %v38_v31 }
  0x27   :  { %555 = vmatpush3.bf16.msra.mxu1 %v554_v32  ;;  %538 = vmatprep.subr.bf16.mxu0 %v606_v0 }
  0x28   :  { %556 = vmatprep.subr.bf16.mxu1 %v606_v0  ;;  %509 = vmatprep.mubr.msk.f32.mxu1 %vm607_vm0, %v608_v1 }
  0x2a   :  { %540 = vmatpush3.bf16.msra.mxu0 %v539_v37 }
  0x2b   :  { %558 = vmatpush3.bf16.msra.mxu1 %v557_v38  ;;  %559 = vmatprep.subr.bf16.mxu0 %v606_v0 }
  0x2d   :  { %480 = vmatmul.mubr.msk.f32.vlgmr.msra.gmra.mrb[0].mxu0 %vm60_vm2, %v47_v41 }
  0x2e   :  { %561 = vmatpush3.bf16.msra.mxu0 %v560_v42  ;;  %510 = vmatmul.mubr.msk.f32.vlgmr.msra.gmra.mrb[2].mxu1 %vm213_vm3, %v208_v43 }
  0x2f   :  { %562 = vmatprep.subr.bf16.mxu0 %v606_v0  ;;  %520 = vmatprep.mubr.msk.f32.mxu0 %vm607_vm0, %v608_v1 }
  0x32   :  { %564 = vmatpush3.bf16.msra.mxu0 %v563_v46 }
  0x35   :  { %521 = vmatmul.mubr.msk.f32.vlgmr.msra.gmra.mrb[2].mxu0 %vm213_vm3, %v37_v47 }
  0xf9   :  { %v204_v48 = vpop.f32.mrb[0].mxu1 }
  0xfa   :  { %v500_v49 = vpop.f32.mrb[1].mxu1 }
 0x100   :  { %v130_v50 = vpop.f32.mrb[0].mxu0 }
 0x101   :  { %v205_v51 = vadd.f32 %v204_v48, %v130_v50  ;;  %v481_v52 = vpop.f32.mrb[1].mxu0  ;;  %v283_v53 = vpop.f32.mrb[2].mxu1 }
 0x102   :  { %v511_v54 = vpop.f32.mrb[3].mxu1 }
 0x103   :  { %v287_v55 = vadd.f32 %v283_v53, %v205_v51 }
 0x108   :  { %v361_v57 = vpop.f32.mrb[2].mxu0 }
 0x109   :  { %v365_v60 = vadd.f32 %v361_v57, %v287_v55  ;;  %v522_v61 = vpop.f32.mrb[3].mxu0 }
 0x10b   :  { %v373_v62 = vadd.f32 %v420_v58, %v365_v60 }
 0x10d   :  { %v377_v63 = vmul.f32 2.0, %v373_v62 }
 0x10f   :  { %v378_v0 = vsel %vm376_vm4, %v377_v63, %v373_v62 }
 0x110   :  { %v421_v1 = vmul.f32 -1.442695, %v378_v0 }
 0x112   :  { %573 = vpow2.f32 %v421_v1 }
 0x11c   :  { %v574_v2 = vpop.eup %573 }
 0x11d   :  { %v382_v3 = vadd.f32 1.0, %v574_v2 }
 0x11f   :  { %575 = vrcp.f32 %v382_v3 }
 0x129   :  { %v576_v4 = vpop.eup %575 }
 0x12a   :  { %v385_v5 = vmul.f32 2.0, %v576_v4 }
 0x12c   :  { %v422_v6 = vadd.f32 -1.0, %v385_v5 }
 0x12e   :  { %v387_v7 = vsel %vm376_vm4, %v422_v6, %v576_v4 }
 0x12f   :  { %390 = vrot.lane.b32.xlu0 %v387_v7, %s609_s3  ;;  %v388_v10 = vmul.f32 %v387_v7, %v37_v47 }
 0x1a1   :  { %v391_v8 = vpop.permute.xlu0 %390 }
 0x1a2   :  { %v393_v9 = vmul.f32 %v391_v8, %v387_v7 }
 0x1a4   :  { %395 = vrot.lane.b32.xlu0 %v393_v9, %s609_s3 }
 0x216   :  { %v396_v11 = vpop.permute.xlu0 %395 }
 0x217   :  { %v398_v12 = vadd.f32 %v396_v11, %v388_v10 }
 0x219   :  { %577 = vtanh.f32 %v398_v12 }
 0x223   :  { %v578_v13 = vpop.eup %577 }
 0x224   :  { %401 = vrot.lane.b32.xlu1 %v578_v13, %s609_s3 }
 0x296   :  { %v402_v14 = vpop.permute.xlu1 %401 }
 0x297   :  { %v404_v15 = vmul.f32 %v402_v14, %v387_v7 }
 0x299   :  { %406 = vrot.lane.b32.xlu1 %v404_v15, %s610_s5 }
 0x30b   :  { %v407_v16 = vpop.permute.xlu1 %406 }
 0x30c   :  { %v409_v17 = vsel %vm213_vm3, %v407_v16, %v398_v12 }
 0x30d   :  { %410 = vst.msk [vmem:[%s709_s6] sm:$0xff] %vm134_vm1, %v409_v17 }
 0x30e   :  { %415 = vsyncpa [#allocation3], 1 }

</bundles_post_ra>
